<compile_context>
chip_gen: v7x
topology: tpu7x:2x2x1
jax: 0.10.0
libtpu: 0.0.40
codegen_flags: <defaults>
</compile_context>

<pallas_src>
import math

import jax
import jax.numpy as jnp
from jax.experimental import pallas as pl
from jax.experimental.pallas import tpu as pltpu

_TARGET_BLOCK_BYTES = 4 * 1024 * 1024   # ~16 MiB total with in+out double-buffering
_VMEM_LIMIT_BYTES = 32 * 1024 * 1024    # explicit: safe on v5e/v6e/v7x
_MIN_SPLIT_BYTES = 512 * 1024           # force >=2 grid steps above this (v7x dual-TC)


# ----------------------------- dense streaming path -----------------------------

def _drop_path_kernel(scale_ref, x_ref, o_ref):
    """out = x * scale  (scale is 0 or 1/keep_prob per row, kept in f32)."""
    # scale_ref: (TR, 1) f32; x_ref / o_ref: (TR, L) in x.dtype.
    o_ref[...] = (x_ref[...] * scale_ref[...]).astype(o_ref.dtype)


def _factor_features(n_features):
    """Factor per-sample size F into (rows, lane) with a lane-dense last dim."""
    for lane in (1024, 896, 768, 640, 512, 384, 256, 128):
        if n_features % lane == 0:
            return n_features // lane, lane
    # No multiple-of-128 divisor: keep the whole slab as the (full-extent)
    # last dim. Block last dim == full array dim is always legal and stays
    # mostly lane-dense (instead of degrading to masked lane-1 stores).
    return 1, n_features


def _sublanes(itemsize):
    return max(8, 32 // itemsize)       # 8 f32, 16 bf16, 32 int8/fp8


def _choose_row_tile(total_rows, lane, itemsize):
    """Pick TR for the 2-D (total_rows, lane) view."""
    sub = _sublanes(itemsize)
    row_bytes = lane * itemsize
    total_bytes = total_rows * row_bytes
    if total_rows <= sub:
        return total_rows               # full first dim: always legal
    tr = max(sub, (int(_TARGET_BLOCK_BYTES // row_bytes) // sub) * sub)
    if total_bytes > _MIN_SPLIT_BYTES:
        # Keep >= 2 grid steps so both v7x TensorCores get work.
        half = -(-total_rows // 2)
        tr = min(tr, max(sub, (half // sub) * sub))
    if tr >= total_rows:
        tr = total_rows
    return tr


def _drop_path_dense(x2, scale_rows, total_rows, lane):
    itemsize = jnp.dtype(x2.dtype).itemsize
    tr = _choose_row_tile(total_rows, lane, itemsize)
    grid = (pl.cdiv(total_rows, tr),)
    return pl.pallas_call(
        _drop_path_kernel,
        out_shape=jax.ShapeDtypeStruct((total_rows, lane), x2.dtype),
        grid_spec=pl.GridSpec(
            grid=grid,
            in_specs=[
                pl.BlockSpec((tr, 1), lambda i: (i, 0)),
                pl.BlockSpec((tr, lane), lambda i: (i, 0)),
            ],
            out_specs=pl.BlockSpec((tr, lane), lambda i: (i, 0)),
        ),
        compiler_params=pltpu.CompilerParams(
            dimension_semantics=("parallel",),
            vmem_limit_bytes=_VMEM_LIMIT_BYTES),
        cost_estimate=pl.CostEstimate(
            flops=x2.size, transcendentals=0,
            bytes_accessed=2 * x2.size * itemsize + total_rows * 4),
    )(scale_rows, x2)


# ------------------------ gated-DMA path (large slabs) -------------------------

def _gated_row_tile(rows, lane, itemsize):
    """Largest row tile that divides `rows`, is a sublane multiple (or == rows),
    and keeps one (tr, lane) slab within the block budget. None if impossible."""
    sub = _sublanes(itemsize)
    row_bytes = lane * itemsize
    budget = max(1, int(_TARGET_BLOCK_BYTES // row_bytes))
    if rows <= budget:
        return rows
    t = (min(budget, rows) // sub) * sub
    while t >= sub:
        if rows % t == 0:
            return t
        t -= sub
    return None


def _make_gated_kernel(inv_keep_prob, tr):
    def kernel(keep_ref, x_hbm, o_ref, xbuf, sem):
        b = pl.program_id(0)
        r = pl.program_id(1)

        @pl.when(keep_ref[b] != 0)
        def _():
            # Only kept samples pay the input read.
            cp = pltpu.make_async_copy(
                x_hbm.at[b, pl.ds(r * tr, tr), :], xbuf, sem.at[0])
            cp.start()
            cp.wait()
            o_ref[0] = (xbuf[...].astype(jnp.float32) * inv_keep_prob
                        ).astype(o_ref.dtype)

        @pl.when(keep_ref[b] == 0)
        def _():
            o_ref[...] = jnp.zeros_like(o_ref)

    return kernel


def _drop_path_gated(x3, keep_i32, inv_keep_prob, rows, lane, tr):
    batch = x3.shape[0]
    itemsize = jnp.dtype(x3.dtype).itemsize
    kernel = _make_gated_kernel(float(inv_keep_prob), tr)
    return pl.pallas_call(
        kernel,
        out_shape=jax.ShapeDtypeStruct((batch, rows, lane), x3.dtype),
        grid_spec=pltpu.PrefetchScalarGridSpec(
            num_scalar_prefetch=1,
            grid=(batch, rows // tr),
            in_specs=[pl.BlockSpec(memory_space=pl.ANY)],
            out_specs=pl.BlockSpec((1, tr, lane), lambda b, r, keep: (b, r, 0)),
            scratch_shapes=[
                pltpu.VMEM((tr, lane), x3.dtype),
                pltpu.SemaphoreType.DMA((1,)),
            ],
        ),
        compiler_params=pltpu.CompilerParams(
            dimension_semantics=("parallel", "arbitrary"),
            vmem_limit_bytes=_VMEM_LIMIT_BYTES),
        cost_estimate=pl.CostEstimate(
            flops=x3.size, transcendentals=0,
            bytes_accessed=2 * x3.size * itemsize),
    )(keep_i32, x3)


# --------------------------------- public API ----------------------------------

def drop_path(x, drop_prob: float = 0.0, training: bool = False, *, key=None,
              gated_min_sample_bytes: int = 1 << 20):
    """JAX/Pallas equivalent of the PyTorch drop_path function (forward only)."""
    if drop_prob == 0.0 or not training:
        return x
    if key is None:
        raise ValueError("drop_path needs a PRNG `key` when training with drop_prob > 0.")
    keep_prob = 1.0 - float(drop_prob)

    batch = x.shape[0]
    feat = int(math.prod(x.shape[1:]))          # arbitrary ndim (torch semantics)
    itemsize = jnp.dtype(x.dtype).itemsize

    # Per-sample keep mask -> scale, precomputed in f32 outside the grid loop.
    u = jax.random.uniform(key, (batch,), dtype=jnp.float32)
    keep_f = jnp.floor(keep_prob + u)           # (B,) 0.0 / 1.0
    scale = keep_f * (1.0 / keep_prob)          # (B,) f32

    rows, lane = _factor_features(feat)
    sample_bytes = feat * itemsize

    # Gated-DMA path: skip the HBM read entirely for dropped samples.
    if sample_bytes >= gated_min_sample_bytes:
        tr = _gated_row_tile(rows, lane, itemsize)
        if tr is not None:
            x3 = x.reshape(batch, rows, lane)
            out = _drop_path_gated(x3, keep_f.astype(jnp.int32),
                                   1.0 / keep_prob, rows, lane, tr)
            return out.reshape(x.shape)

    # Dense streaming path: collapse to 2-D (batch*rows, lane) so every block is
    # sublane/lane dense regardless of the per-sample slab shape.
    total_rows = batch * rows
    x2 = x.reshape(total_rows, lane)
    scale_rows = jnp.repeat(scale, rows).reshape(total_rows, 1)
    out = _drop_path_dense(x2, scale_rows, total_rows, lane)
    return out.reshape(x.shape)


class DropPath:
    """Mirror of the PyTorch DropPath module (forward only)."""

    def __init__(self, drop_prob=None):
        self.drop_prob = drop_prob
        self.training = True  # torch default for a freshly built module

    def __call__(self, x, *, key=None):
        p = 0.0 if self.drop_prob is None else self.drop_prob
        return drop_path(x, p, self.training, key=key)


if __name__ == "__main__":
    root = jax.random.PRNGKey(0)
    kx, ku, kx2, ku2, kx3, ku3 = jax.random.split(root, 6)

    drop_prob = 0.25
    keep_prob = 1.0 - drop_prob

    # --- main test: ViT-style token tensor (batch, tokens, hidden) ---
    B, N, D = 2, 8, 32
    x = jax.random.normal(kx, (B, N, D), dtype=jnp.float32)

    module = DropPath(drop_prob=drop_prob)
    module.training = True
    out = jax.block_until_ready(module(x, key=ku))

    u = jax.random.uniform(ku, (B,), dtype=jnp.float32)
    mask = jnp.floor(keep_prob + u).reshape(B, 1, 1)
    ref = x / keep_prob * mask
    assert out.shape == x.shape and out.dtype == x.dtype
    assert jnp.allclose(out, ref, rtol=1e-6, atol=1e-6), "3-D mismatch vs reference"

    # --- arbitrary-ndim input (torch drop_path supports any ndim) ---
    x4 = jax.random.normal(kx2, (2, 4, 16, 16), dtype=jnp.float32)
    out4 = jax.block_until_ready(drop_path(x4, drop_prob, True, key=ku2))
    u4 = jax.random.uniform(ku2, (2,), dtype=jnp.float32)
    mask4 = jnp.floor(keep_prob + u4).reshape(2, 1, 1, 1)
    ref4 = x4 / keep_prob * mask4
    assert jnp.allclose(out4, ref4, rtol=1e-6, atol=1e-6), "4-D mismatch vs reference"

    # --- gated-DMA path (manual copy skipped for dropped samples), forced on ---
    Bg, Ng, Dg = 8, 32, 256
    dpg = 0.5
    xg = jax.random.normal(kx3, (Bg, Ng, Dg), dtype=jnp.float32)
    outg = jax.block_until_ready(
        drop_path(xg, dpg, True, key=ku3, gated_min_sample_bytes=0))
    ug = jax.random.uniform(ku3, (Bg,), dtype=jnp.float32)
    maskg = jnp.floor((1.0 - dpg) + ug).reshape(Bg, 1, 1)
    refg = xg / (1.0 - dpg) * maskg
    assert jnp.allclose(outg, refg, rtol=1e-6, atol=1e-6), "gated-path mismatch"

    # --- eval / drop_prob==0 path is identity (no kernel launch), as in PyTorch ---
    module.training = False
    out_eval = jax.block_until_ready(module(x, key=ku))
    assert jnp.array_equal(out_eval, x)

    print("KERNEL_OK")
</pallas_src>

<mosaic_0001>
module attributes {stable_mosaic.version = 11 : i64} {
  func.func @_drop_path_kernel(%arg0: i32, %arg1: memref<2x1xf32, #tpu.memory_space<vmem>>, %arg2: memref<2x256xf32, #tpu.memory_space<vmem>>, %arg3: memref<2x256xf32, #tpu.memory_space<vmem>>) attributes {dimension_semantics = [#tpu.dimension_semantics<parallel>], iteration_bounds = array<i64: 1>, scalar_prefetch = 0 : i64, scratch_operands = 0 : i64, tpu.core_type = #tpu.core_type<tc>, window_params = [{transform_indices = @transform_0, window_bounds = array<i64: 2, 1>}, {transform_indices = @transform_1, window_bounds = array<i64: 2, 256>}, {transform_indices = @transform_2, window_bounds = array<i64: 2, 256>}]} {
    %c0 = arith.constant 0 : index
    %c0_0 = arith.constant 0 : index
    %0 = vector.load %arg2[%c0, %c0_0] : memref<2x256xf32, #tpu.memory_space<vmem>>, vector<2x256xf32>
    %c0_1 = arith.constant 0 : index
    %c0_2 = arith.constant 0 : index
    %1 = vector.load %arg1[%c0_1, %c0_2] : memref<2x1xf32, #tpu.memory_space<vmem>>, vector<2x1xf32>
    %2 = vector.broadcast %1 : vector<2x1xf32> to vector<2x256xf32>
    %3 = arith.mulf %0, %2 : vector<2x256xf32>
    %c0_3 = arith.constant 0 : index
    %c0_4 = arith.constant 0 : index
    %4 = vector.load %arg3[%c0_3, %c0_4] : memref<2x256xf32, #tpu.memory_space<vmem>>, vector<2x256xf32>
    tpu.vector_store %arg3[%c0_3, %c0_4], %3 {strides = array<i32>} : memref<2x256xf32, #tpu.memory_space<vmem>>, vector<2x256xf32>,
    return
  }
  func.func @transform_0(%arg0: i32) -> (i32, i32) {
    %c0_i32 = arith.constant 0 : i32
    %c0_i32_0 = arith.constant 0 : i32
    return %arg0, %c0_i32 : i32, i32
  }
  func.func @transform_1(%arg0: i32) -> (i32, i32) {
    %c0_i32 = arith.constant 0 : i32
    %c0_i32_0 = arith.constant 0 : i32
    return %arg0, %c0_i32 : i32, i32
  }
  func.func @transform_2(%arg0: i32) -> (i32, i32) {
    %c0_i32 = arith.constant 0 : i32
    %c0_i32_0 = arith.constant 0 : i32
    return %arg0, %c0_i32 : i32, i32
  }
}

</mosaic_0001>

<bundles_post_ra>
// kernel: tpu_custom_call.1
= control target key start
LH: loop header
LB: loop body
LE: loop exit
PB: predicated region body
PF: predicated region fallthrough
CT: control target
= control target key end

     0   :  { %v70_v1 = vmov 0   ;;  %s106_s0 = inlined_call_operand.vmem [shape: f32[2,1], index: 0, kind: input, shape index: {}]   ;;  %s107_s1 = inlined_call_operand.vmem [shape: f32[2,256], index: 1, kind: input, shape index: {}]   ;;  %s108_s2 = inlined_call_operand.hbm [shape: f32[2,256], index: 2, kind: output, shape index: {}]  }
   0x1   :  { %v13_v0 = vld [vmem:[%s106_s0] sm:$0x3]  ;;  %45 = vset.pattern.permute.xlu0 %v70_v1 }
   0x2   :  { %7 = vsyncpa [#allocation3], 0  ;;  %16 = vperm.xlu0 %45, %v13_v0   ;;  %v71_v2 = vmov 269488144   ;;  %v21_v4 = vlaneseq  ;;  %v12_v9 = vld [vmem:[%s107_s1] sm:$0xf] }
   0x3   :  { %v19_v3 = vunpack.c.l.s4 %v71_v2  ;;  %s72_s13 = smov [#allocation2]  }
   0x4   :  { %v22_v6 = vshrl.u32 %v21_v4, 7  ;;  %s34_s14 = sshll.u32 %s72_s13, 4  ;;  %s35_s14 = int_to_ptr.vmem [resolvable:$true] %s34_s14 }
   0x5   :  { %v20_v5 = vunpack.c.0.s8 %v19_v3  ;;  %s46_s0 = scalar_lea.vmem %s35_s14, 64  ;;  %p51_p1 = scmp.lt.s32.totalorder %s35_s14, %s35_s14 }
   0x6   :  { %p47_p0 = scmp.ne.s32.totalorder %s35_s14, %s46_s0  ;;  %p52_p2 = scmp.lt.s32.totalorder %s46_s0, %s46_s0 }
   0x7   :  { %v23_v7 = vsub.s32 %v20_v5, %v22_v6 }
   0x8   :  { %p53_p3 = por %p52_p2, %p51_p1 }
   0xa   :  { %p54_p4 = pnand %p53_p3, %p47_p0 }
  0x81   :  { %v17_v8 = vpop.permute.xlu0 %16 }
  0x82   :  { %v24_v10 = vrot.slane %v17_v8, %v23_v7 }
  0x84   :  { %v26_v11 = vmul.f32 %v24_v10, %v12_v9 }
  0x86   :  { %27 = vst [vmem:[#allocation2] sm:$0xf] %v26_v11 }
  0x87   :  { %57 = shalt.err (!%p54_p4)
}
  0x88   :  { %s58_s17 = scalar_lea.hbm %s108_s2, 64 }
  0x89   :  { %p59_p5 = scmp.ne.s32.totalorder %s108_s2, %s58_s17  ;;  %p62_p6 = scmp.lt.u32.totalorder %s58_s17, %s108_s2 }
  0x8b   :  { %p64_p7 = pnand %p62_p6, %p59_p5 }
  0x8d   :  { %67 = shalt.err (!%p64_p7)
}
  0x8e   :  { %37 = dma.vmem_to_hbm [thread:$0]  %s35_s14, 64, %s108_s2, [#allocation3]  }
  0x8f   :  { %68 = dma.done.wait [#allocation3], 64  }
  0x90   :  { %69 = vsyncadd [#allocation3], 4294967232 }
  0x91   :  { %41 = vsyncpa [#allocation3], 1 }

</bundles_post_ra>
